<compile_context>
chip_gen: v7x
topology: tpu7x:2x2x1
jax: 0.10.0
libtpu: 0.0.40
codegen_flags: <defaults>
</compile_context>

<pallas_src>
import jax
import jax.numpy as jnp
from jax.experimental import pallas as pl
from jax.experimental.pallas import tpu as pltpu


# -----------------------------------------------------------------------------
# Banded conv weight: fold the 3x3 kernel's kx taps + W zero-padding into a
# block-tridiagonal (W*Cin, W*Cout) matrix per ky (built once, wrapper side).
#   B[ky, wi*Cin + ci, wo*Cout + co] = w[ky, wi-wo+1, ci, co]  if |wi-wo| <= 1
# -----------------------------------------------------------------------------
def _banded_weight(w_hwio, W):
    KH, KW, Cin, Cout = w_hwio.shape
    B = jnp.zeros((KH, W * Cin, W * Cout), w_hwio.dtype)
    for wo in range(W):
        for kx in range(KW):
            wi = wo + kx - 1
            if 0 <= wi < W:
                B = B.at[:, wi * Cin:(wi + 1) * Cin,
                         wo * Cout:(wo + 1) * Cout].set(w_hwio[:, kx])
    return B


def _conv_core(xg, b_ref, scale_ref, bias_ref, pad_ref, H):
    """Shared conv + folded-BN + ReLU core (lane-dense, per-batch)."""
    wci = pad_ref.shape[1]
    # In-kernel zero padding of the H halo only (W padding lives in the weight).
    # Scratch is f32 so the offset-1 row store stays trivially aligned.
    zero_row = jnp.zeros((1, wci), pad_ref.dtype)
    pad_ref[pl.ds(0, 1), :] = zero_row
    pad_ref[pl.ds(H + 1, 1), :] = zero_row
    pad_ref[pl.ds(1, H), :] = xg.astype(pad_ref.dtype)

    # 3 MXU pushes: (H, W*Cin) @ (W*Cin, W*Cout), bf16 in / f32 accumulate.
    acc = jnp.zeros((H, b_ref.shape[2]), jnp.float32)
    for ky in range(3):
        lhs = pad_ref[pl.ds(ky, H), :].astype(jnp.bfloat16)
        acc = acc + jnp.dot(lhs, b_ref[ky], preferred_element_type=jnp.float32)

    # f32 epilogue: folded BN (pre-tiled per-lane scale/bias) + ReLU.
    return jnp.maximum(acc * scale_ref[...] + bias_ref[...], 0.0)


# -----------------------------------------------------------------------------
# Fused kernel: conv1+BN+ReLU -> SE gate -> rescale -> conv2+BN+ReLU
# -----------------------------------------------------------------------------
def _center_kernel(x_ref, b1_ref, s1_ref, bi1_ref,
                   m1_ref, sb1_ref, m2_ref, sb2_ref,
                   b2_ref, s2_ref, bi2_ref,
                   o_ref, pad1_ref, pad2_ref):
    # x_ref   : (1, H, W*Cin)      bf16   lane-dense input rows
    # b1/b2   : (3, W*Ci, W*Co)    bf16   banded conv weights
    # s*/bi*  : (1, W*Cout)        f32    folded BN scale/bias, channel-tiled
    # m1/m2   : (W*Cout, W*Cout)   f32    SE matrices (pool+fc1 / fc2+tile folded)
    # sb1/sb2 : (1, W*Cout)        f32    SE biases, channel-tiled
    # o_ref   : (1, H, W*Cout)     f32
    H = o_ref.shape[1]

    # conv1 + folded BN + ReLU (f32 result, stays in VMEM/registers).
    y1 = _conv_core(x_ref[0], b1_ref, s1_ref, bi1_ref, pad1_ref, H)  # (H, W*C)

    # SE squeeze-excite, fully lane-dense:
    #   rsum @ m1 == relu-input of fc1 pre-tiled over W;  z @ m2 == fc2 pre-tiled.
    rsum = jnp.sum(y1, axis=0, keepdims=True)                        # (1, W*C)
    z = jnp.maximum(
        jnp.dot(rsum, m1_ref[...], preferred_element_type=jnp.float32)
        + sb1_ref[...], 0.0)                                         # (1, W*C)
    gate = jax.nn.sigmoid(
        jnp.dot(z, m2_ref[...], preferred_element_type=jnp.float32)
        + sb2_ref[...])                                              # (1, W*C)

    # Channel rescale fused into conv2's input, then conv2 + BN + ReLU.
    o_ref[0] = _conv_core(y1 * gate, b2_ref, s2_ref, bi2_ref, pad2_ref, H)


# -----------------------------------------------------------------------------
# CenterBlock forward (wrapper: NCHW in / NCHW out, like PyTorch)
# -----------------------------------------------------------------------------
def center_block(x_nchw, p):
    N, Cin, H, W = x_nchw.shape
    Cout = p["w1"].shape[-1]
    wci, wco = W * Cin, W * Cout

    # NCHW -> lane-dense (N, H, W*Cin), bf16 for MXU + halved activation DMA.
    x_ld = jnp.transpose(x_nchw, (0, 2, 3, 1)).reshape(
        N, H, wci).astype(jnp.bfloat16)

    b1 = _banded_weight(p["w1"], W).astype(jnp.bfloat16)   # (3, W*Cin,  W*Cout)
    b2 = _banded_weight(p["w2"], W).astype(jnp.bfloat16)   # (3, W*Cout, W*Cout)
    s1 = jnp.tile(p["scale1"], (1, W))                     # (1, W*Cout) f32
    bi1 = jnp.tile(p["bias1"], (1, W))
    s2 = jnp.tile(p["scale2"], (1, W))
    bi2 = jnp.tile(p["bias2"], (1, W))

    # SE weights pre-widened so the in-kernel SE matmuls are K = N = W*C (128):
    #   red : (W*C, C)  sums the W blocks and divides by H*W  (global avg pool)
    #   rep : (C, W*C)  tiles a per-channel vector over the W lane blocks
    eye = jnp.eye(Cout, dtype=jnp.float32)
    red = jnp.tile(eye, (W, 1)) / float(H * W)
    rep = jnp.tile(eye, (1, W))
    m1 = red @ p["se_w1"] @ rep                            # (W*C, W*C)
    sb1 = jnp.tile(p["se_b1"], (1, W))                     # (1, W*C)
    m2 = jnp.tile(p["se_w2"] @ rep, (W, 1)) / float(W)     # (W*C, W*C)
    sb2 = jnp.tile(p["se_b2"], (1, W))                     # (1, W*C)

    out_ld = pl.pallas_call(
        _center_kernel,
        out_shape=jax.ShapeDtypeStruct((N, H, wco), jnp.float32),
        grid=(N,),
        in_specs=[
            pl.BlockSpec((1, H, wci), lambda n: (n, 0, 0)),
            pl.BlockSpec((3, wci, wco), lambda n: (0, 0, 0)),
            pl.BlockSpec((1, wco), lambda n: (0, 0)),
            pl.BlockSpec((1, wco), lambda n: (0, 0)),
            pl.BlockSpec((wco, wco), lambda n: (0, 0)),
            pl.BlockSpec((1, wco), lambda n: (0, 0)),
            pl.BlockSpec((wco, wco), lambda n: (0, 0)),
            pl.BlockSpec((1, wco), lambda n: (0, 0)),
            pl.BlockSpec((3, wco, wco), lambda n: (0, 0, 0)),
            pl.BlockSpec((1, wco), lambda n: (0, 0)),
            pl.BlockSpec((1, wco), lambda n: (0, 0)),
        ],
        out_specs=pl.BlockSpec((1, H, wco), lambda n: (n, 0, 0)),
        scratch_shapes=[pltpu.VMEM((H + 2, wci), jnp.float32),
                        pltpu.VMEM((H + 2, wco), jnp.float32)],
        compiler_params=pltpu.CompilerParams(
            dimension_semantics=("parallel",)),
    )(x_ld, b1, s1, bi1, m1, sb1, m2, sb2, b2, s2, bi2)

    out = out_ld.reshape(N, H, W, Cout)
    return jnp.transpose(out, (0, 3, 1, 2))                # NHWC -> NCHW


# -----------------------------------------------------------------------------
# Pure-JAX reference (same math, f32) for a correctness check
# -----------------------------------------------------------------------------
def center_block_ref(x_nchw, p):
    x = jnp.transpose(x_nchw, (0, 2, 3, 1))

    def conv_bn_relu(x, w, s, b):
        y = jax.lax.conv_general_dilated(
            x, w, (1, 1), "SAME",
            dimension_numbers=("NHWC", "HWIO", "NHWC"))
        return jnp.maximum(y * s + b, 0.0)

    y = conv_bn_relu(x, p["w1"], p["scale1"], p["bias1"])
    pooled = jnp.mean(y, axis=(1, 2))                            # (N, C)
    z = jnp.maximum(pooled @ p["se_w1"] + p["se_b1"], 0.0)
    a = jax.nn.sigmoid(z @ p["se_w2"] + p["se_b2"])              # (N, C)
    y = y * a[:, None, None, :]
    y = conv_bn_relu(y, p["w2"], p["scale2"], p["bias2"])
    return jnp.transpose(y, (0, 3, 1, 2))


def _folded_bn(kg, kb, km, kv, c, eps=1e-5):
    gamma = 1.0 + 0.1 * jax.random.normal(kg, (c,), jnp.float32)
    beta = 0.1 * jax.random.normal(kb, (c,), jnp.float32)
    mean = 0.1 * jax.random.normal(km, (c,), jnp.float32)
    var = 0.5 + jax.random.uniform(kv, (c,), jnp.float32)
    inv = gamma / jnp.sqrt(var + eps)
    return inv.reshape(1, c), (beta - mean * inv).reshape(1, c)


if __name__ == "__main__":
    N, Cin, Cout, H, W = 2, 4, 8, 16, 16

    key = jax.random.PRNGKey(0)
    ks = jax.random.split(key, 16)

    x = jax.random.normal(ks[0], (N, Cin, H, W), jnp.float32)

    scale1, bias1 = _folded_bn(ks[2], ks[3], ks[4], ks[5], Cout)
    scale2, bias2 = _folded_bn(ks[9], ks[10], ks[11], ks[12], Cout)
    params = {
        "w1": 0.1 * jax.random.normal(ks[1], (3, 3, Cin, Cout), jnp.float32),
        "scale1": scale1, "bias1": bias1,
        "se_w1": 0.2 * jax.random.normal(ks[6], (Cout, Cout), jnp.float32),
        "se_b1": 0.1 * jax.random.normal(ks[7], (1, Cout), jnp.float32),
        "se_w2": 0.2 * jax.random.normal(ks[13], (Cout, Cout), jnp.float32),
        "se_b2": 0.1 * jax.random.normal(ks[14], (1, Cout), jnp.float32),
        "w2": 0.1 * jax.random.normal(ks[8], (3, 3, Cout, Cout), jnp.float32),
        "scale2": scale2, "bias2": bias2,
    }

    out = jax.block_until_ready(jax.jit(center_block)(x, params))
    ref = jax.block_until_ready(center_block_ref(x, params))

    assert out.shape == (N, Cout, H, W), out.shape
    # bf16 MXU inputs (conv weights + activations) => slightly looser tolerance
    # than a pure-f32 path.
    err = float(jnp.max(jnp.abs(out - ref)))
    assert jnp.allclose(out, ref, rtol=2e-2, atol=2e-2), err

    print("KERNEL_OK")
</pallas_src>

<mosaic_0001>
module attributes {stable_mosaic.version = 11 : i64} {
  func.func @_center_kernel(%arg0: i32, %arg1: memref<1x16x64xbf16, #tpu.memory_space<vmem>>, %arg2: memref<3x64x128xbf16, #tpu.memory_space<vmem>>, %arg3: memref<1x128xf32, #tpu.memory_space<vmem>>, %arg4: memref<1x128xf32, #tpu.memory_space<vmem>>, %arg5: memref<128x128xf32, #tpu.memory_space<vmem>>, %arg6: memref<1x128xf32, #tpu.memory_space<vmem>>, %arg7: memref<128x128xf32, #tpu.memory_space<vmem>>, %arg8: memref<1x128xf32, #tpu.memory_space<vmem>>, %arg9: memref<3x128x128xbf16, #tpu.memory_space<vmem>>, %arg10: memref<1x128xf32, #tpu.memory_space<vmem>>, %arg11: memref<1x128xf32, #tpu.memory_space<vmem>>, %arg12: memref<1x16x128xf32, #tpu.memory_space<vmem>>, %arg13: memref<18x64xf32, #tpu.memory_space<vmem>>, %arg14: memref<18x128xf32, #tpu.memory_space<vmem>>) attributes {dimension_semantics = [#tpu.dimension_semantics<parallel>], iteration_bounds = array<i64: 2>, scalar_prefetch = 0 : i64, scratch_operands = 2 : i64, tpu.core_type = #tpu.core_type<tc>, window_params = [{transform_indices = @transform_0, window_bounds = array<i64: 1, 16, 64>}, {pipeline_mode = #tpu.pipeline_mode<synchronous>, transform_indices = @transform_1, window_bounds = array<i64: 3, 64, 128>}, {pipeline_mode = #tpu.pipeline_mode<synchronous>, transform_indices = @transform_2, window_bounds = array<i64: 1, 128>}, {pipeline_mode = #tpu.pipeline_mode<synchronous>, transform_indices = @transform_3, window_bounds = array<i64: 1, 128>}, {pipeline_mode = #tpu.pipeline_mode<synchronous>, transform_indices = @transform_4, window_bounds = array<i64: 128, 128>}, {pipeline_mode = #tpu.pipeline_mode<synchronous>, transform_indices = @transform_5, window_bounds = array<i64: 1, 128>}, {pipeline_mode = #tpu.pipeline_mode<synchronous>, transform_indices = @transform_6, window_bounds = array<i64: 128, 128>}, {pipeline_mode = #tpu.pipeline_mode<synchronous>, transform_indices = @transform_7, window_bounds = array<i64: 1, 128>}, {pipeline_mode = #tpu.pipeline_mode<synchronous>, transform_indices = @transform_8, window_bounds = array<i64: 3, 128, 128>}, {pipeline_mode = #tpu.pipeline_mode<synchronous>, transform_indices = @transform_9, window_bounds = array<i64: 1, 128>}, {pipeline_mode = #tpu.pipeline_mode<synchronous>, transform_indices = @transform_10, window_bounds = array<i64: 1, 128>}, {transform_indices = @transform_11, window_bounds = array<i64: 1, 16, 128>}]} {
    %c0 = arith.constant 0 : index
    %c0_0 = arith.constant 0 : index
    %c0_1 = arith.constant 0 : index
    %0 = vector.load %arg1[%c0, %c0_0, %c0_1] : memref<1x16x64xbf16, #tpu.memory_space<vmem>>, vector<1x16x64xbf16>
    %1 = vector.shape_cast %0 : vector<1x16x64xbf16> to vector<16x64xbf16>
    %cst = arith.constant 0.000000e+00 : f32
    %2 = vector.broadcast %cst : f32 to vector<1x64xf32>
    %c0_2 = arith.constant 0 : index
    %c0_3 = arith.constant 0 : index
    %3 = vector.load %arg13[%c0_2, %c0_3] : memref<18x64xf32, #tpu.memory_space<vmem>>, vector<1x64xf32>
    tpu.vector_store %arg13[%c0_2, %c0_3], %2 {strides = array<i32>} : memref<18x64xf32, #tpu.memory_space<vmem>>, vector<1x64xf32>,
    %c17 = arith.constant 17 : index
    %c0_4 = arith.constant 0 : index
    %4 = vector.load %arg13[%c17, %c0_4] : memref<18x64xf32, #tpu.memory_space<vmem>>, vector<1x64xf32>
    tpu.vector_store %arg13[%c17, %c0_4], %2 {strides = array<i32>} : memref<18x64xf32, #tpu.memory_space<vmem>>, vector<1x64xf32>,
    %5 = arith.extf %1 : vector<16x64xbf16> to vector<16x64xf32>
    %c1 = arith.constant 1 : index
    %c0_5 = arith.constant 0 : index
    %6 = vector.load %arg13[%c1, %c0_5] : memref<18x64xf32, #tpu.memory_space<vmem>>, vector<16x64xf32>
    tpu.vector_store %arg13[%c1, %c0_5], %5 {strides = array<i32>} : memref<18x64xf32, #tpu.memory_space<vmem>>, vector<16x64xf32>,
    %cst_6 = arith.constant 0.000000e+00 : f32
    %7 = vector.broadcast %cst_6 : f32 to vector<16x128xf32>
    %c0_7 = arith.constant 0 : index
    %c0_8 = arith.constant 0 : index
    %8 = vector.load %arg13[%c0_7, %c0_8] : memref<18x64xf32, #tpu.memory_space<vmem>>, vector<16x64xf32>
    %9 = arith.truncf %8 : vector<16x64xf32> to vector<16x64xbf16>
    %c0_9 = arith.constant 0 : index
    %c0_10 = arith.constant 0 : index
    %c0_11 = arith.constant 0 : index
    %10 = vector.load %arg2[%c0_9, %c0_10, %c0_11] : memref<3x64x128xbf16, #tpu.memory_space<vmem>>, vector<1x64x128xbf16>
    %11 = vector.shape_cast %10 : vector<1x64x128xbf16> to vector<64x128xbf16>
    %cst_12 = arith.constant dense<0.000000e+00> : vector<16x128xf32>
    %12 = tpu.matmul %9, %11, %cst_12 {dimension_numbers = #tpu.dot_dimension_numbers<[1], [0], [0], [1], [0, 0, 1, 1], [], []>} : vector<16x64xbf16>, vector<64x128xbf16>, vector<16x128xf32> -> vector<16x128xf32>
    %13 = arith.addf %7, %12 : vector<16x128xf32>
    %c1_13 = arith.constant 1 : index
    %c0_14 = arith.constant 0 : index
    %14 = vector.load %arg13[%c1_13, %c0_14] : memref<18x64xf32, #tpu.memory_space<vmem>>, vector<16x64xf32>
    %15 = arith.truncf %14 : vector<16x64xf32> to vector<16x64xbf16>
    %c1_15 = arith.constant 1 : index
    %c0_16 = arith.constant 0 : index
    %c0_17 = arith.constant 0 : index
    %16 = vector.load %arg2[%c1_15, %c0_16, %c0_17] : memref<3x64x128xbf16, #tpu.memory_space<vmem>>, vector<1x64x128xbf16>
    %17 = vector.shape_cast %16 : vector<1x64x128xbf16> to vector<64x128xbf16>
    %cst_18 = arith.constant dense<0.000000e+00> : vector<16x128xf32>
    %18 = tpu.matmul %15, %17, %cst_18 {dimension_numbers = #tpu.dot_dimension_numbers<[1], [0], [0], [1], [0, 0, 1, 1], [], []>} : vector<16x64xbf16>, vector<64x128xbf16>, vector<16x128xf32> -> vector<16x128xf32>
    %19 = arith.addf %13, %18 : vector<16x128xf32>
    %c2 = arith.constant 2 : index
    %c0_19 = arith.constant 0 : index
    %20 = vector.load %arg13[%c2, %c0_19] : memref<18x64xf32, #tpu.memory_space<vmem>>, vector<16x64xf32>
    %21 = arith.truncf %20 : vector<16x64xf32> to vector<16x64xbf16>
    %c2_20 = arith.constant 2 : index
    %c0_21 = arith.constant 0 : index
    %c0_22 = arith.constant 0 : index
    %22 = vector.load %arg2[%c2_20, %c0_21, %c0_22] : memref<3x64x128xbf16, #tpu.memory_space<vmem>>, vector<1x64x128xbf16>
    %23 = vector.shape_cast %22 : vector<1x64x128xbf16> to vector<64x128xbf16>
    %cst_23 = arith.constant dense<0.000000e+00> : vector<16x128xf32>
    %24 = tpu.matmul %21, %23, %cst_23 {dimension_numbers = #tpu.dot_dimension_numbers<[1], [0], [0], [1], [0, 0, 1, 1], [], []>} : vector<16x64xbf16>, vector<64x128xbf16>, vector<16x128xf32> -> vector<16x128xf32>
    %25 = arith.addf %19, %24 : vector<16x128xf32>
    %c0_24 = arith.constant 0 : index
    %c0_25 = arith.constant 0 : index
    %26 = vector.load %arg3[%c0_24, %c0_25] : memref<1x128xf32, #tpu.memory_space<vmem>>, vector<1x128xf32>
    %27 = vector.broadcast %26 : vector<1x128xf32> to vector<16x128xf32>
    %28 = arith.mulf %25, %27 : vector<16x128xf32>
    %c0_26 = arith.constant 0 : index
    %c0_27 = arith.constant 0 : index
    %29 = vector.load %arg4[%c0_26, %c0_27] : memref<1x128xf32, #tpu.memory_space<vmem>>, vector<1x128xf32>
    %30 = vector.broadcast %29 : vector<1x128xf32> to vector<16x128xf32>
    %31 = arith.addf %28, %30 : vector<16x128xf32>
    %cst_28 = arith.constant 0.000000e+00 : f32
    %32 = vector.broadcast %cst_28 : f32 to vector<16x128xf32>
    %33 = arith.maximumf %31, %32 : vector<16x128xf32>
    %cst_29 = arith.constant dense<0.000000e+00> : vector<128xf32>
    %34 = vector.multi_reduction <add>, %33, %cst_29 [0] : vector<16x128xf32> to vector<128xf32>
    %35 = vector.shape_cast %34 : vector<128xf32> to vector<1x128xf32>
    %c0_30 = arith.constant 0 : index
    %c0_31 = arith.constant 0 : index
    %36 = vector.load %arg5[%c0_30, %c0_31] : memref<128x128xf32, #tpu.memory_space<vmem>>, vector<128x128xf32>
    %cst_32 = arith.constant dense<0.000000e+00> : vector<1x128xf32>
    %37 = tpu.matmul %35, %36, %cst_32 {dimension_numbers = #tpu.dot_dimension_numbers<[1], [0], [0], [1], [0, 0, 1, 1], [], []>} : vector<1x128xf32>, vector<128x128xf32>, vector<1x128xf32> -> vector<1x128xf32>
    %c0_33 = arith.constant 0 : index
    %c0_34 = arith.constant 0 : index
    %38 = vector.load %arg6[%c0_33, %c0_34] : memref<1x128xf32, #tpu.memory_space<vmem>>, vector<1x128xf32>
    %39 = arith.addf %37, %38 : vector<1x128xf32>
    %cst_35 = arith.constant 0.000000e+00 : f32
    %40 = vector.broadcast %cst_35 : f32 to vector<1x128xf32>
    %41 = arith.maximumf %39, %40 : vector<1x128xf32>
    %c0_36 = arith.constant 0 : index
    %c0_37 = arith.constant 0 : index
    %42 = vector.load %arg7[%c0_36, %c0_37] : memref<128x128xf32, #tpu.memory_space<vmem>>, vector<128x128xf32>
    %cst_38 = arith.constant dense<0.000000e+00> : vector<1x128xf32>
    %43 = tpu.matmul %41, %42, %cst_38 {dimension_numbers = #tpu.dot_dimension_numbers<[1], [0], [0], [1], [0, 0, 1, 1], [], []>} : vector<1x128xf32>, vector<128x128xf32>, vector<1x128xf32> -> vector<1x128xf32>
    %c0_39 = arith.constant 0 : index
    %c0_40 = arith.constant 0 : index
    %44 = vector.load %arg8[%c0_39, %c0_40] : memref<1x128xf32, #tpu.memory_space<vmem>>, vector<1x128xf32>
    %45 = arith.addf %43, %44 : vector<1x128xf32>
    %46 = arith.negf %45 : vector<1x128xf32>
    %47 = math.exp %46 : vector<1x128xf32>
    %cst_41 = arith.constant 1.000000e+00 : f32
    %48 = vector.broadcast %cst_41 : f32 to vector<1x128xf32>
    %49 = arith.addf %48, %47 : vector<1x128xf32>
    %50 = arith.divf %48, %49 : vector<1x128xf32>
    %51 = vector.broadcast %50 : vector<1x128xf32> to vector<16x128xf32>
    %52 = arith.mulf %33, %51 : vector<16x128xf32>
    %cst_42 = arith.constant 0.000000e+00 : f32
    %53 = vector.broadcast %cst_42 : f32 to vector<1x128xf32>
    %c0_43 = arith.constant 0 : index
    %c0_44 = arith.constant 0 : index
    %54 = vector.load %arg14[%c0_43, %c0_44] : memref<18x128xf32, #tpu.memory_space<vmem>>, vector<1x128xf32>
    tpu.vector_store %arg14[%c0_43, %c0_44], %53 {strides = array<i32>} : memref<18x128xf32, #tpu.memory_space<vmem>>, vector<1x128xf32>,
    %c17_45 = arith.constant 17 : index
    %c0_46 = arith.constant 0 : index
    %55 = vector.load %arg14[%c17_45, %c0_46] : memref<18x128xf32, #tpu.memory_space<vmem>>, vector<1x128xf32>
    tpu.vector_store %arg14[%c17_45, %c0_46], %53 {strides = array<i32>} : memref<18x128xf32, #tpu.memory_space<vmem>>, vector<1x128xf32>,
    %c1_47 = arith.constant 1 : index
    %c0_48 = arith.constant 0 : index
    %56 = vector.load %arg14[%c1_47, %c0_48] : memref<18x128xf32, #tpu.memory_space<vmem>>, vector<16x128xf32>
    tpu.vector_store %arg14[%c1_47, %c0_48], %52 {strides = array<i32>} : memref<18x128xf32, #tpu.memory_space<vmem>>, vector<16x128xf32>,
    %cst_49 = arith.constant 0.000000e+00 : f32
    %57 = vector.broadcast %cst_49 : f32 to vector<16x128xf32>
    %c0_50 = arith.constant 0 : index
    %c0_51 = arith.constant 0 : index
    %58 = vector.load %arg14[%c0_50, %c0_51] : memref<18x128xf32, #tpu.memory_space<vmem>>, vector<16x128xf32>
    %59 = arith.truncf %58 : vector<16x128xf32> to vector<16x128xbf16>
    %c0_52 = arith.constant 0 : index
    %c0_53 = arith.constant 0 : index
    %c0_54 = arith.constant 0 : index
    %60 = vector.load %arg9[%c0_52, %c0_53, %c0_54] : memref<3x128x128xbf16, #tpu.memory_space<vmem>>, vector<1x128x128xbf16>
    %61 = vector.shape_cast %60 : vector<1x128x128xbf16> to vector<128x128xbf16>
    %cst_55 = arith.constant dense<0.000000e+00> : vector<16x128xf32>
    %62 = tpu.matmul %59, %61, %cst_55 {dimension_numbers = #tpu.dot_dimension_numbers<[1], [0], [0], [1], [0, 0, 1, 1], [], []>} : vector<16x128xbf16>, vector<128x128xbf16>, vector<16x128xf32> -> vector<16x128xf32>
    %63 = arith.addf %57, %62 : vector<16x128xf32>
    %c1_56 = arith.constant 1 : index
    %c0_57 = arith.constant 0 : index
    %64 = vector.load %arg14[%c1_56, %c0_57] : memref<18x128xf32, #tpu.memory_space<vmem>>, vector<16x128xf32>
    %65 = arith.truncf %64 : vector<16x128xf32> to vector<16x128xbf16>
    %c1_58 = arith.constant 1 : index
    %c0_59 = arith.constant 0 : index
    %c0_60 = arith.constant 0 : index
    %66 = vector.load %arg9[%c1_58, %c0_59, %c0_60] : memref<3x128x128xbf16, #tpu.memory_space<vmem>>, vector<1x128x128xbf16>
    %67 = vector.shape_cast %66 : vector<1x128x128xbf16> to vector<128x128xbf16>
    %cst_61 = arith.constant dense<0.000000e+00> : vector<16x128xf32>
    %68 = tpu.matmul %65, %67, %cst_61 {dimension_numbers = #tpu.dot_dimension_numbers<[1], [0], [0], [1], [0, 0, 1, 1], [], []>} : vector<16x128xbf16>, vector<128x128xbf16>, vector<16x128xf32> -> vector<16x128xf32>
    %69 = arith.addf %63, %68 : vector<16x128xf32>
    %c2_62 = arith.constant 2 : index
    %c0_63 = arith.constant 0 : index
    %70 = vector.load %arg14[%c2_62, %c0_63] : memref<18x128xf32, #tpu.memory_space<vmem>>, vector<16x128xf32>
    %71 = arith.truncf %70 : vector<16x128xf32> to vector<16x128xbf16>
    %c2_64 = arith.constant 2 : index
    %c0_65 = arith.constant 0 : index
    %c0_66 = arith.constant 0 : index
    %72 = vector.load %arg9[%c2_64, %c0_65, %c0_66] : memref<3x128x128xbf16, #tpu.memory_space<vmem>>, vector<1x128x128xbf16>
    %73 = vector.shape_cast %72 : vector<1x128x128xbf16> to vector<128x128xbf16>
    %cst_67 = arith.constant dense<0.000000e+00> : vector<16x128xf32>
    %74 = tpu.matmul %71, %73, %cst_67 {dimension_numbers = #tpu.dot_dimension_numbers<[1], [0], [0], [1], [0, 0, 1, 1], [], []>} : vector<16x128xbf16>, vector<128x128xbf16>, vector<16x128xf32> -> vector<16x128xf32>
    %75 = arith.addf %69, %74 : vector<16x128xf32>
    %c0_68 = arith.constant 0 : index
    %c0_69 = arith.constant 0 : index
    %76 = vector.load %arg10[%c0_68, %c0_69] : memref<1x128xf32, #tpu.memory_space<vmem>>, vector<1x128xf32>
    %77 = vector.broadcast %76 : vector<1x128xf32> to vector<16x128xf32>
    %78 = arith.mulf %75, %77 : vector<16x128xf32>
    %c0_70 = arith.constant 0 : index
    %c0_71 = arith.constant 0 : index
    %79 = vector.load %arg11[%c0_70, %c0_71] : memref<1x128xf32, #tpu.memory_space<vmem>>, vector<1x128xf32>
    %80 = vector.broadcast %79 : vector<1x128xf32> to vector<16x128xf32>
    %81 = arith.addf %78, %80 : vector<16x128xf32>
    %cst_72 = arith.constant 0.000000e+00 : f32
    %82 = vector.broadcast %cst_72 : f32 to vector<16x128xf32>
    %83 = arith.maximumf %81, %82 : vector<16x128xf32>
    %c0_73 = arith.constant 0 : index
    %c0_74 = arith.constant 0 : index
    %c0_75 = arith.constant 0 : index
    %84 = vector.load %arg12[%c0_73, %c0_74, %c0_75] : memref<1x16x128xf32, #tpu.memory_space<vmem>>, vector<1x16x128xf32>
    %85 = vector.shape_cast %84 : vector<1x16x128xf32> to vector<16x128xf32>
    %86 = vector.shape_cast %83 : vector<16x128xf32> to vector<1x16x128xf32>
    tpu.vector_store %arg12[%c0_73, %c0_74, %c0_75], %86 {strides = array<i32>} : memref<1x16x128xf32, #tpu.memory_space<vmem>>, vector<1x16x128xf32>,
    return
  }
  func.func @transform_0(%arg0: i32) -> (i32, i32, i32) {
    %c0_i32 = arith.constant 0 : i32
    %c0_i32_0 = arith.constant 0 : i32
    %c0_i32_1 = arith.constant 0 : i32
    return %arg0, %c0_i32, %c0_i32_0 : i32, i32, i32
  }
  func.func @transform_1(%arg0: i32) -> (i32, i32, i32) {
    %c0_i32 = arith.constant 0 : i32
    %c0_i32_0 = arith.constant 0 : i32
    %c0_i32_1 = arith.constant 0 : i32
    %c0_i32_2 = arith.constant 0 : i32
    return %c0_i32, %c0_i32_0, %c0_i32_1 : i32, i32, i32
  }
  func.func @transform_2(%arg0: i32) -> (i32, i32) {
    %c0_i32 = arith.constant 0 : i32
    %c0_i32_0 = arith.constant 0 : i32
    %c0_i32_1 = arith.constant 0 : i32
    return %c0_i32, %c0_i32_0 : i32, i32
  }
  func.func @transform_3(%arg0: i32) -> (i32, i32) {
    %c0_i32 = arith.constant 0 : i32
    %c0_i32_0 = arith.constant 0 : i32
    %c0_i32_1 = arith.constant 0 : i32
    return %c0_i32, %c0_i32_0 : i32, i32
  }
  func.func @transform_4(%arg0: i32) -> (i32, i32) {
    %c0_i32 = arith.constant 0 : i32
    %c0_i32_0 = arith.constant 0 : i32
    %c0_i32_1 = arith.constant 0 : i32
    return %c0_i32, %c0_i32_0 : i32, i32
  }
  func.func @transform_5(%arg0: i32) -> (i32, i32) {
    %c0_i32 = arith.constant 0 : i32
    %c0_i32_0 = arith.constant 0 : i32
    %c0_i32_1 = arith.constant 0 : i32
    return %c0_i32, %c0_i32_0 : i32, i32
  }
  func.func @transform_6(%arg0: i32) -> (i32, i32) {
    %c0_i32 = arith.constant 0 : i32
    %c0_i32_0 = arith.constant 0 : i32
    %c0_i32_1 = arith.constant 0 : i32
    return %c0_i32, %c0_i32_0 : i32, i32
  }
  func.func @transform_7(%arg0: i32) -> (i32, i32) {
    %c0_i32 = arith.constant 0 : i32
    %c0_i32_0 = arith.constant 0 : i32
    %c0_i32_1 = arith.constant 0 : i32
    return %c0_i32, %c0_i32_0 : i32, i32
  }
  func.func @transform_8(%arg0: i32) -> (i32, i32, i32) {
    %c0_i32 = arith.constant 0 : i32
    %c0_i32_0 = arith.constant 0 : i32
    %c0_i32_1 = arith.constant 0 : i32
    %c0_i32_2 = arith.constant 0 : i32
    return %c0_i32, %c0_i32_0, %c0_i32_1 : i32, i32, i32
  }
  func.func @transform_9(%arg0: i32) -> (i32, i32) {
    %c0_i32 = arith.constant 0 : i32
    %c0_i32_0 = arith.constant 0 : i32
    %c0_i32_1 = arith.constant 0 : i32
    return %c0_i32, %c0_i32_0 : i32, i32
  }
  func.func @transform_10(%arg0: i32) -> (i32, i32) {
    %c0_i32 = arith.constant 0 : i32
    %c0_i32_0 = arith.constant 0 : i32
    %c0_i32_1 = arith.constant 0 : i32
    return %c0_i32, %c0_i32_0 : i32, i32
  }
  func.func @transform_11(%arg0: i32) -> (i32, i32, i32) {
    %c0_i32 = arith.constant 0 : i32
    %c0_i32_0 = arith.constant 0 : i32
    %c0_i32_1 = arith.constant 0 : i32
    return %arg0, %c0_i32, %c0_i32_0 : i32, i32, i32
  }
}

</mosaic_0001>

<bundles_post_ra>
// kernel: tile.74
= control target key start
LH: loop header
LB: loop body
LE: loop exit
PB: predicated region body
PF: predicated region fallthrough
CT: control target
= control target key end

     0   :  { %s739_s18 = smov 3  ;;  %s741_s19 = smov 12  ;;  %vm261_vm0 = vcmask 1043458   ;;  %vm265_vm1 = vcmask 1045508   ;;  %vm269_vm2 = vcmask 1047558   ;;  %vm271_vm3 = vcmask 64512   ;;  %s829_s0 = inlined_call_operand.vmem [shape: bf16[8,16,8], index: 0, kind: input, shape index: {}]   ;;  %s830_s1 = inlined_call_operand.vmem [shape: bf16[8,128], index: 1, kind: output, shape index: {}]  }
   0x1   :  { %v672_v0 = vld [vmem:[%s829_s0 + $0x38] sm:$0xff]   ;;  %v673_v1 = vld [vmem:[%s829_s0 + $0x30] sm:$0xff]   ;;  %v674_v2 = vld [vmem:[%s829_s0 + $0x28] sm:$0xff]   ;;  %s751_s24 = smov 192  ;;  %s753_s25 = smov 3  ;;  %vm293_vm4 = vcmask 1048512  }
   0x2   :  { %v643_v3 = vunpack.c.h.bf16 %v672_v0  ;;  %v647_v4 = vunpack.c.h.bf16 %v673_v1  ;;  %v651_v5 = vunpack.c.h.bf16 %v674_v2  ;;  %v675_v6 = vld [vmem:[%s829_s0 + $0x20] sm:$0xff]   ;;  %v676_v7 = vld [vmem:[%s829_s0 + $0x18] sm:$0xff]   ;;  %v677_v8 = vld [vmem:[%s829_s0 + $0x10] sm:$0xff]   ;;  %v642_v9 = vunpack.c.l.bf16 %v672_v0  ;;  %s755_s26 = smov 12  ;;  %s757_s27 = smov 48 }
   0x3   :  { %v655_v10 = vunpack.c.h.bf16 %v675_v6  ;;  %v659_v11 = vunpack.c.h.bf16 %v676_v7  ;;  %v663_v12 = vunpack.c.h.bf16 %v677_v8  ;;  %v678_v13 = vld [vmem:[%s829_s0 + $0x8] sm:$0xff]   ;;  %v669_v14 = vld [vmem:[%s829_s0] sm:$0xff]   ;;  %s749_s0 = smov 48  ;;  %v646_v15 = vunpack.c.l.bf16 %v673_v1  ;;  %s759_s28 = smov 192 }
   0x4   :  { %20 = vst [vmem:[#allocation1 + $0x78] sm:$0xff] %v643_v3  ;;  %52 = vst [vmem:[#allocation1 + $0x68] sm:$0xff] %v647_v4  ;;  %v667_v16 = vunpack.c.h.bf16 %v678_v13  ;;  %v671_v17 = vunpack.c.h.bf16 %v669_v14  ;;  %v650_v18 = vunpack.c.l.bf16 %v674_v2  ;;  %v654_v19 = vunpack.c.l.bf16 %v675_v6  ;;  %s296_s29 = smov 3  ;;  %s299_s30 = smov 12 }
   0x5   :  { %84 = vst [vmem:[#allocation1 + $0x58] sm:$0xff] %v651_v5  ;;  %36 = vst [vmem:[#allocation1 + $0x70] sm:$0xff] %v642_v9  ;;  %v658_v20 = vunpack.c.l.bf16 %v676_v7  ;;  %v662_v21 = vunpack.c.l.bf16 %v677_v8  ;;  %v666_v22 = vunpack.c.l.bf16 %v678_v13  ;;  %v670_v23 = vunpack.c.l.bf16 %v669_v14  ;;  %s304_s2 = smov 48  ;;  %s309_s3 = smov 192 }
   0x6   :  { %116 = vst [vmem:[#allocation1 + $0x48] sm:$0xff] %v655_v10  ;;  %148 = vst [vmem:[#allocation1 + $0x38] sm:$0xff] %v659_v11  ;;  %s340_s4 = smov 3  ;;  %s343_s5 = smov 12  ;;  %vm315_vm5 = vcmask 982912   ;;  %vm337_vm6 = vcmask 917312  }
   0x7   :  { %180 = vst [vmem:[#allocation1 + $0x28] sm:$0xff] %v663_v12  ;;  %68 = vst [vmem:[#allocation1 + $0x60] sm:$0xff] %v646_v15  ;;  %s348_s6 = smov 48  ;;  %s761_s7 = smov 192  ;;  %vm359_vm7 = vcmask 851712   ;;  %vm381_vm8 = vcmask 786112  }
   0x8   :  { %212 = vst [vmem:[#allocation1 + $0x18] sm:$0xff] %v667_v16  ;;  %243 = vst [vmem:[#allocation1 + $0x8] sm:$0xff] %v671_v17  ;;  %s763_s8 = smov 3  ;;  %s765_s9 = smov 12  ;;  %vm403_vm9 = vcmask 720512   ;;  %vm425_vm10 = vcmask 654912  }
   0x9   :  { %100 = vst [vmem:[#allocation1 + $0x50] sm:$0xff] %v650_v18  ;;  %132 = vst [vmem:[#allocation1 + $0x40] sm:$0xff] %v654_v19  ;;  %s695_s10 = smov 120   ;;  %s696_s11 = smov 104   ;;  %vm447_vm11 = vcmask 589312   ;;  %vm469_vm12 = vcmask 523712  }
   0xa   :  { %164 = vst [vmem:[#allocation1 + $0x30] sm:$0xff] %v658_v20  ;;  %196 = vst [vmem:[#allocation1 + $0x20] sm:$0xff] %v662_v21  ;;  %s370_s12 = smov 48  ;;  %s375_s13 = smov 192  ;;  %vm491_vm13 = vcmask 458112   ;;  %vm513_vm14 = vcmask 392512  }
   0xb   :  { %228 = vst [vmem:[#allocation1 + $0x10] sm:$0xff] %v666_v22  ;;  %256 = vst [vmem:[#allocation1] sm:$0xff] %v670_v23  ;;  %s384_s14 = smov 3  ;;  %s697_s15 = smov 112   ;;  %vm535_vm15 = vcmask 326912  }
   0xc   :  { %s387_s16 = smov 12  ;;  %s392_s17 = smov 48 }
   0xd   :  { %s406_s20 = smov 3  ;;  %s409_s21 = smov 12 }
   0xe   :  { %s414_s22 = smov 48  ;;  %s419_s23 = smov 192 }
   0xf   :  { %v275_v24 = vld [vmem:[#allocation1 + $0xf] ss:$16 sm:%s739_s18]   ;;  %v319_v29 = vld [vmem:[#allocation1 + $0xd] ss:$16 sm:%s753_s25]   ;;  %v297_v35 = vld [vmem:[#allocation1 + $0xe] ss:$16 sm:%s296_s29]  }
  0x10   :  { %v278_v25 = vld [vmem:[#allocation1 + $0xf] ss:$16 sm:%s741_s19]   ;;  %v322_v30 = vld [vmem:[#allocation1 + $0xd] ss:$16 sm:%s755_s26]   ;;  %v300_v38 = vld [vmem:[#allocation1 + $0xe] ss:$16 sm:%s299_s30]  }
  0x11   :  { %v283_v26 = vld [vmem:[#allocation1 + $0xf] ss:$16 sm:%s749_s0]   ;;  %v280_v27 = vsel %vm261_vm0, %v278_v25, %v275_v24  ;;  %v324_v32 = vsel %vm261_vm0, %v322_v30, %v319_v29  ;;  %v327_v33 = vld [vmem:[#allocation1 + $0xd] ss:$16 sm:%s757_s27]   ;;  %v305_v39 = vld [vmem:[#allocation1 + $0xe] ss:$16 sm:%s304_s2]   ;;  %v302_v42 = vsel %vm261_vm0, %v300_v38, %v297_v35 }
  0x12   :  { %v288_v28 = vld [vmem:[#allocation1 + $0xf] ss:$16 sm:%s751_s24]   ;;  %v285_v31 = vsel %vm265_vm1, %v283_v26, %v280_v27  ;;  %v332_v34 = vld [vmem:[#allocation1 + $0xd] ss:$16 sm:%s759_s28]   ;;  %v329_v37 = vsel %vm265_vm1, %v327_v33, %v324_v32  ;;  %v310_v40 = vld [vmem:[#allocation1 + $0xe] ss:$16 sm:%s309_s3]   ;;  %v307_v46 = vsel %vm265_vm1, %v305_v39, %v302_v42 }
  0x13   :  { %v290_v36 = vsel %vm269_vm2, %v288_v28, %v285_v31  ;;  %v334_v41 = vsel %vm269_vm2, %v332_v34, %v329_v37  ;;  %v341_v43 = vld [vmem:[#allocation1 + $0xc] ss:$16 sm:%s340_s4]   ;;  %v363_v49 = vld [vmem:[#allocation1 + $0xb] ss:$16 sm:%s763_s8]   ;;  %v312_v51 = vsel %vm269_vm2, %v310_v40, %v307_v46  ;;  %v385_v58 = vld [vmem:[#allocation1 + $0xa] ss:$16 sm:%s384_s14]  }
  0x14   :  { %291 = vrot.lane.b32.xlu0 %v290_v36, %s695_s10  ;;  %v344_v44 = vld [vmem:[#allocation1 + $0xc] ss:$16 sm:%s343_s5]   ;;  %335 = vrot.lane.b32.xlu1 %v334_v41, %s696_s11  ;;  %v366_v50 = vld [vmem:[#allocation1 + $0xb] ss:$16 sm:%s765_s9]   ;;  %s698_s18 = smov 96   ;;  %s397_s19 = smov 192 }
  0x15   :  { %v349_v45 = vld [vmem:[#allocation1 + $0xc] ss:$16 sm:%s348_s6]   ;;  %v346_v47 = vsel %vm261_vm0, %v344_v44, %v341_v43  ;;  %v368_v53 = vsel %vm261_vm0, %v366_v50, %v363_v49  ;;  %v371_v55 = vld [vmem:[#allocation1 + $0xb] ss:$16 sm:%s370_s12]   ;;  %v388_v60 = vld [vmem:[#allocation1 + $0xa] ss:$16 sm:%s387_s16]  }
  0x16   :  { %v354_v48 = vld [vmem:[#allocation1 + $0xc] ss:$16 sm:%s761_s7]   ;;  %v351_v52 = vsel %vm265_vm1, %v349_v45, %v346_v47  ;;  %v376_v56 = vld [vmem:[#allocation1 + $0xb] ss:$16 sm:%s375_s13]   ;;  %v373_v57 = vsel %vm265_vm1, %v371_v55, %v368_v53  ;;  %v393_v61 = vld [vmem:[#allocation1 + $0xa] ss:$16 sm:%s392_s17]   ;;  %v390_v62 = vsel %vm261_vm0, %v388_v60, %v385_v58 }
  0x17   :  { %v356_v54 = vsel %vm269_vm2, %v354_v48, %v351_v52  ;;  %v378_v59 = vsel %vm269_vm2, %v376_v56, %v373_v57  ;;  %v398_v63 = vld [vmem:[#allocation1 + $0xa] ss:$16 sm:%s397_s19]   ;;  %v395_v0 = vsel %vm265_vm1, %v393_v61, %v390_v62  ;;  %v407_v1 = vld [vmem:[#allocation1 + $0x9] ss:$16 sm:%s406_s20]   ;;  %s699_s0 = smov 88   ;;  %s428_s24 = smov 3 }
  0x18   :  { %313 = vrot.lane.b32.xlu0 %v312_v51, %s697_s15  ;;  %357 = vrot.lane.b32.xlu1 %v356_v54, %s698_s18  ;;  %v410_v2 = vld [vmem:[#allocation1 + $0x9] ss:$16 sm:%s409_s21]   ;;  %v400_v3 = vsel %vm269_vm2, %v398_v63, %v395_v0  ;;  %s700_s25 = smov 80   ;;  %v429_v8 = vld [vmem:[#allocation1 + $0x8] ss:$16 sm:%s428_s24]   ;;  %s431_s26 = smov 12 }
  0x19   :  { %v412_v4 = vsel %vm261_vm0, %v410_v2, %v407_v1  ;;  %v415_v5 = vld [vmem:[#allocation1 + $0x9] ss:$16 sm:%s414_s22]   ;;  %s436_s27 = smov 48  ;;  %v432_v10 = vld [vmem:[#allocation1 + $0x8] ss:$16 sm:%s431_s26]   ;;  %s441_s28 = smov 192 }
  0x1a   :  { %v420_v6 = vld [vmem:[#allocation1 + $0x9] ss:$16 sm:%s419_s23]   ;;  %v417_v7 = vsel %vm265_vm1, %v415_v5, %v412_v4  ;;  %v437_v11 = vld [vmem:[#allocation1 + $0x8] ss:$16 sm:%s436_s27]   ;;  %v434_v12 = vsel %vm261_vm0, %v432_v10, %v429_v8  ;;  %s450_s29 = smov 3  ;;  %s453_s30 = smov 12 }
  0x1b   :  { %v422_v9 = vsel %vm269_vm2, %v420_v6, %v417_v7  ;;  %v442_v13 = vld [vmem:[#allocation1 + $0x8] ss:$16 sm:%s441_s28]   ;;  %s701_s2 = smov 72   ;;  %v439_v14 = vsel %vm265_vm1, %v437_v11, %v434_v12  ;;  %v451_v15 = vld [vmem:[#allocation1 + $0x7] ss:$16 sm:%s450_s29]   ;;  %s458_s3 = smov 48 }
  0x1c   :  { %379 = vrot.lane.b32.xlu0 %v378_v59, %s699_s0  ;;  %401 = vrot.lane.b32.xlu1 %v400_v3, %s700_s25  ;;  %v454_v16 = vld [vmem:[#allocation1 + $0x7] ss:$16 sm:%s453_s30]   ;;  %s463_s4 = smov 192  ;;  %v444_v17 = vsel %vm269_vm2, %v442_v13, %v439_v14  ;;  %s472_s5 = smov 3 }
  0x1d   :  { %v456_v18 = vsel %vm261_vm0, %v454_v16, %v451_v15  ;;  %v459_v19 = vld [vmem:[#allocation1 + $0x7] ss:$16 sm:%s458_s3]   ;;  %s702_s6 = smov 64   ;;  %v473_v22 = vld [vmem:[#allocation1 + $0x6] ss:$16 sm:%s472_s5]   ;;  %s475_s7 = smov 12 }
  0x1e   :  { %v464_v20 = vld [vmem:[#allocation1 + $0x7] ss:$16 sm:%s463_s4]   ;;  %v461_v21 = vsel %vm265_vm1, %v459_v19, %v456_v18  ;;  %s480_s8 = smov 48  ;;  %v476_v24 = vld [vmem:[#allocation1 + $0x6] ss:$16 sm:%s475_s7]   ;;  %s485_s9 = smov 192 }
  0x1f   :  { %v466_v23 = vsel %vm269_vm2, %v464_v20, %v461_v21  ;;  %v481_v25 = vld [vmem:[#allocation1 + $0x6] ss:$16 sm:%s480_s8]   ;;  %s703_s10 = smov 56   ;;  %v478_v26 = vsel %vm261_vm0, %v476_v24, %v473_v22  ;;  %s494_s11 = smov 3  ;;  %v710_v24 = vmov 0.0  }
  0x20   :  { %423 = vrot.lane.b32.xlu0 %v422_v9, %s701_s2  ;;  %445 = vrot.lane.b32.xlu1 %v444_v17, %s702_s6  ;;  %v486_v27 = vld [vmem:[#allocation1 + $0x6] ss:$16 sm:%s485_s9]   ;;  %s497_s12 = smov 12  ;;  %v483_v28 = vsel %vm265_vm1, %v481_v25, %v478_v26  ;;  %v495_v29 = vld [vmem:[#allocation1 + $0x5] ss:$16 sm:%s494_s11]   ;;  %s502_s13 = smov 48 }
  0x21   :  { %v498_v30 = vld [vmem:[#allocation1 + $0x5] ss:$16 sm:%s497_s12]   ;;  %s507_s14 = smov 192  ;;  %v488_v31 = vsel %vm269_vm2, %v486_v27, %v483_v28  ;;  %s516_s15 = smov 3 }
  0x22   :  { %v500_v32 = vsel %vm261_vm0, %v498_v30, %v495_v29  ;;  %v503_v33 = vld [vmem:[#allocation1 + $0x5] ss:$16 sm:%s502_s13]   ;;  %s704_s16 = smov 48   ;;  %v517_v36 = vld [vmem:[#allocation1 + $0x4] ss:$16 sm:%s516_s15]   ;;  %s519_s17 = smov 12 }
  0x23   :  { %v508_v34 = vld [vmem:[#allocation1 + $0x5] ss:$16 sm:%s507_s14]   ;;  %v505_v35 = vsel %vm265_vm1, %v503_v33, %v500_v32  ;;  %s524_s18 = smov 48  ;;  %v520_v38 = vld [vmem:[#allocation1 + $0x4] ss:$16 sm:%s519_s17]   ;;  %s529_s19 = smov 192 }
  0x24   :  { %467 = vrot.lane.b32.xlu0 %v466_v23, %s703_s10  ;;  %489 = vrot.lane.b32.xlu1 %v488_v31, %s704_s16  ;;  %v510_v37 = vsel %vm269_vm2, %v508_v34, %v505_v35  ;;  %v525_v39 = vld [vmem:[#allocation1 + $0x4] ss:$16 sm:%s524_s18]   ;;  %s705_s20 = smov 40   ;;  %v522_v40 = vsel %vm261_vm0, %v520_v38, %v517_v36  ;;  %s538_s21 = smov 3 }
  0x25   :  { %v530_v41 = vld [vmem:[#allocation1 + $0x4] ss:$16 sm:%s529_s19]   ;;  %s541_s22 = smov 12  ;;  %v527_v42 = vsel %vm265_vm1, %v525_v39, %v522_v40  ;;  %v539_v43 = vld [vmem:[#allocation1 + $0x3] ss:$16 sm:%s538_s21]   ;;  %s546_s23 = smov 48 }
  0x26   :  { %v542_v44 = vld [vmem:[#allocation1 + $0x3] ss:$16 sm:%s541_s22]   ;;  %s551_s0 = smov 192  ;;  %v532_v45 = vsel %vm269_vm2, %v530_v41, %v527_v42  ;;  %s560_s24 = smov 3 }
  0x27   :  { %v544_v46 = vsel %vm261_vm0, %v542_v44, %v539_v43  ;;  %v547_v47 = vld [vmem:[#allocation1 + $0x3] ss:$16 sm:%s546_s23]   ;;  %s706_s25 = smov 32   ;;  %v561_v50 = vld [vmem:[#allocation1 + $0x2] ss:$16 sm:%s560_s24]   ;;  %s563_s26 = smov 12 }
  0x28   :  { %511 = vrot.lane.b32.xlu0 %v510_v37, %s705_s20  ;;  %v552_v48 = vld [vmem:[#allocation1 + $0x3] ss:$16 sm:%s551_s0]   ;;  %533 = vrot.lane.b32.xlu1 %v532_v45, %s706_s25  ;;  %v549_v49 = vsel %vm265_vm1, %v547_v47, %v544_v46  ;;  %s568_s27 = smov 48  ;;  %v564_v52 = vld [vmem:[#allocation1 + $0x2] ss:$16 sm:%s563_s26]   ;;  %s573_s28 = smov 192 }
  0x29   :  { %v554_v51 = vsel %vm269_vm2, %v552_v48, %v549_v49  ;;  %v569_v53 = vld [vmem:[#allocation1 + $0x2] ss:$16 sm:%s568_s27]   ;;  %s707_s29 = smov 24   ;;  %v566_v54 = vsel %vm261_vm0, %v564_v52, %v561_v50  ;;  %s582_s30 = smov 3 }
  0x2a   :  { %v574_v55 = vld [vmem:[#allocation1 + $0x2] ss:$16 sm:%s573_s28]   ;;  %s585_s2 = smov 12  ;;  %v571_v56 = vsel %vm265_vm1, %v569_v53, %v566_v54  ;;  %v583_v57 = vld [vmem:[#allocation1 + $0x1] ss:$16 sm:%s582_s30]   ;;  %s590_s3 = smov 48 }
  0x2b   :  { %v586_v58 = vld [vmem:[#allocation1 + $0x1] ss:$16 sm:%s585_s2]   ;;  %s595_s4 = smov 192  ;;  %v576_v59 = vsel %vm269_vm2, %v574_v55, %v571_v56  ;;  %s257_s5 = smov 3 }
  0x2c   :  { %555 = vrot.lane.b32.xlu0 %v554_v51, %s707_s29  ;;  %v588_v60 = vsel %vm261_vm0, %v586_v58, %v583_v57  ;;  %v591_v61 = vld [vmem:[#allocation1 + $0x1] ss:$16 sm:%s590_s3]   ;;  %s708_s6 = smov 16   ;;  %s259_s7 = smov 12  ;;  %v258_v0 = vld [vmem:[#allocation1] ss:$16 sm:%s257_s5]  }
  0x2d   :  { %v596_v62 = vld [vmem:[#allocation1 + $0x1] ss:$16 sm:%s595_s4]   ;;  %577 = vrot.lane.b32.xlu1 %v576_v59, %s708_s6  ;;  %v593_v63 = vsel %vm265_vm1, %v591_v61, %v588_v60  ;;  %s263_s8 = smov 48  ;;  %s267_s9 = smov 192  ;;  %v260_v2 = vld [vmem:[#allocation1] ss:$16 sm:%s259_s7]  }
  0x2e   :  { %v598_v1 = vsel %vm269_vm2, %v596_v62, %v593_v63  ;;  %v264_v3 = vld [vmem:[#allocation1] ss:$16 sm:%s263_s8]   ;;  %s709_s10 = smov 8   ;;  %v262_v4 = vsel %vm261_vm0, %v260_v2, %v258_v0  ;;  %vm557_vm0 = vcmask 261312  }
  0x2f   :  { %v268_v5 = vld [vmem:[#allocation1] ss:$16 sm:%s267_s9]   ;;  %v266_v6 = vsel %vm265_vm1, %v264_v3, %v262_v4  ;;  %vm579_vm1 = vcmask 195712  }
  0x30   :  { %599 = vrot.lane.b32.xlu0 %v598_v1, %s709_s10  ;;  %v270_v7 = vsel %vm269_vm2, %v268_v5, %v266_v6  ;;  %vm601_vm2 = vcmask 130112  }
  0x31   :  { %272 = vst.msk [vmem:[#allocation0] sm:$0xff] %vm271_vm3, %v270_v7  }
  0x86   :  { %v292_v8 = vpop.permute.xlu0 %291   ;;  %v336_v9 = vpop.permute.xlu1 %335  }
  0x87   :  { %294 = vst.msk [vmem:[#allocation0] sm:$0xff] %vm293_vm4, %v292_v8  }
  0x8a   :  { %v314_v10 = vpop.permute.xlu0 %313   ;;  %v358_v11 = vpop.permute.xlu1 %357  }
  0x8b   :  { %316 = vst.msk [vmem:[#allocation0] sm:$0xff] %vm315_vm5, %v314_v10  }
  0x8c   :  { %338 = vst.msk [vmem:[#allocation0] sm:$0xff] %vm337_vm6, %v336_v9  }
  0x8d   :  { %360 = vst.msk [vmem:[#allocation0] sm:$0xff] %vm359_vm7, %v358_v11  }
  0x8e   :  { %v380_v12 = vpop.permute.xlu0 %379   ;;  %v402_v13 = vpop.permute.xlu1 %401  }
  0x8f   :  { %382 = vst.msk [vmem:[#allocation0] sm:$0xff] %vm381_vm8, %v380_v12  }
  0x90   :  { %404 = vst.msk [vmem:[#allocation0] sm:$0xff] %vm403_vm9, %v402_v13  }
  0x92   :  { %v424_v14 = vpop.permute.xlu0 %423   ;;  %v446_v15 = vpop.permute.xlu1 %445  }
  0x93   :  { %426 = vst.msk [vmem:[#allocation0] sm:$0xff] %vm425_vm10, %v424_v14  }
  0x94   :  { %448 = vst.msk [vmem:[#allocation0] sm:$0xff] %vm447_vm11, %v446_v15  }
  0x96   :  { %v468_v16 = vpop.permute.xlu0 %467   ;;  %v490_v17 = vpop.permute.xlu1 %489  }
  0x97   :  { %470 = vst.msk [vmem:[#allocation0] sm:$0xff] %vm469_vm12, %v468_v16  }
  0x98   :  { %492 = vst.msk [vmem:[#allocation0] sm:$0xff] %vm491_vm13, %v490_v17  }
  0x9a   :  { %v512_v18 = vpop.permute.xlu0 %511   ;;  %v534_v19 = vpop.permute.xlu1 %533  }
  0x9b   :  { %514 = vst.msk [vmem:[#allocation0] sm:$0xff] %vm513_vm14, %v512_v18  }
  0x9c   :  { %536 = vst.msk [vmem:[#allocation0] sm:$0xff] %vm535_vm15, %v534_v19  }
  0x9e   :  { %v556_v20 = vpop.permute.xlu0 %555  }
  0x9f   :  { %558 = vst.msk [vmem:[#allocation0] sm:$0xff] %vm557_vm0, %v556_v20   ;;  %v578_v21 = vpop.permute.xlu1 %577  }
  0xa0   :  { %580 = vst.msk [vmem:[#allocation0] sm:$0xff] %vm579_vm1, %v578_v21  }
  0xa2   :  { %v600_v22 = vpop.permute.xlu0 %599  }
  0xa3   :  { %602 = vst.msk [vmem:[#allocation0] sm:$0xff] %vm601_vm2, %v600_v22  }
  0xaa   :  { %v607_v23 = vld [vmem:[#allocation0] sm:$0xff] }
  0xab   :  { %v608_v25 = vpack.c.bf16 %v710_v24, %v607_v23 }
  0xad   :  { %610 = vst [vmem:[%s830_s1] sm:$0xf] %v608_v25 }

// kernel: center_block.1
= control target key start
LH: loop header
LB: loop body
LE: loop exit
PB: predicated region body
PF: predicated region fallthrough
CT: control target
= control target key end

     0   :  { %s1797_s17 = smov 0   ;;  %s2131_s0 = inlined_call_operand.vmem [shape: bf16[2,16,64], index: 0, kind: input, shape index: {}]   ;;  %s2132_s1 = inlined_call_operand.vmem [shape: bf16[3,64,128], index: 1, kind: input, shape index: {}]   ;;  %s2133_s2 = inlined_call_operand.vmem [shape: f32[1,128], index: 2, kind: input, shape index: {}]   ;;  %s2134_s3 = inlined_call_operand.vmem [shape: f32[1,128], index: 3, kind: input, shape index: {}]   ;;  %s2135_s4 = inlined_call_operand.vmem [shape: f32[128,128], index: 4, kind: input, shape index: {}]   ;;  %s2136_s5 = inlined_call_operand.vmem [shape: f32[1,128], index: 5, kind: input, shape index: {}]   ;;  %s2137_s6 = inlined_call_operand.vmem [shape: f32[128,128], index: 6, kind: input, shape index: {}]   ;;  %s2138_s7 = inlined_call_operand.vmem [shape: f32[1,128], index: 7, kind: input, shape index: {}]   ;;  %s2139_s8 = inlined_call_operand.vmem [shape: bf16[3,128,128], index: 8, kind: input, shape index: {}]   ;;  %s2140_s9 = inlined_call_operand.vmem [shape: f32[1,128], index: 9, kind: input, shape index: {}]   ;;  %s2141_s10 = inlined_call_operand.vmem [shape: f32[1,128], index: 10, kind: input, shape index: {}]   ;;  %s2142_s11 = inlined_call_operand.vmem [shape: f32[2,16,128], index: 11, kind: output, shape index: {}]  }
   0x1 LB: > { %s1262_s18 = sadd.s32 4294967295, %s1732_s17   ;;  %p1266_p0 = scmp.ge.s32.totalorder %s1732_s17, 1  ;;  %s1732_s17 = sphi %s1797_s17, %s21_s17  }
   0x2   : > { %p337_p1 = scmp.lt.s32.totalorder %s1732_s17, 3 }
   0x4   : > { %p338_p2 = pnand %p1266_p0, %p337_p1 }
   0x5   : > { %v1686_v0 = vld [vmem:[%s2132_s1 + $0x20] sm:$0xff] (!%p338_p2)   ;;  %v1734_v1 = vmov (!%p338_p2), 0.0   ;;  %v1687_v2 = vld [vmem:[%s2132_s1 + $0x28] sm:$0xff] (!%p338_p2)   ;;  %vm1735_vm0 = vmmov (!%p338_p2), 0   ;;  %p377_p3 = scmp.lt.s32.totalorder (!%p338_p2), %s1262_s18, 1  ;;  %vm390_vm1 = vcmask (!%p338_p2), 516096  }
   0x6   : > { %341 = sbr.rel (%p338_p2) target bundleno = 1020 (0x3fc), region = 64  ;;  %1447 = vmatprep.subr.bf16.mxu0 (!%p338_p2), %v1734_v1  ;;  %853 = vst [vmem:[#allocation3] sm:$0x1] (!%p338_p2), %v1734_v1  ;;  %854 = vst [vmem:[#allocation3 + $0x11] sm:$0x1] (!%p338_p2), %v1734_v1  ;;  %1455 = vmatprep.mubr.msk.bf16.mxu0 (!%p338_p2), %vm1735_vm0, %v1734_v1  ;;  %v1688_v3 = vld [vmem:[%s2132_s1 + $0x30] sm:$0xff] (!%p338_p2)  }
   0x7   : > { %1448 = vmatpush3.bf16.msra.mxu0 (!%p338_p2), %v1686_v0  ;;  %1515 = vmatprep.mubr.msk.f32.mxu1 (!%p338_p2), %vm1735_vm0, %v1734_v1  ;;  %391 = vst.msk [vmem:[#allocation2] sm:$0x1] (!%p338_p2), %vm390_vm1, %v1734_v1  ;;  %392 = vst.msk [vmem:[#allocation2 + $0x11] sm:$0x1] (!%p338_p2), %vm390_vm1, %v1734_v1  ;;  %vm395_vm2 = vcmask (!%p338_p2), 523264   ;;  %v1736_v5 = vmov (!%p338_p2), 0.0|0.0  }
   0x8   : > { %1449 = vmatprep.subr.bf16.mxu0 (!%p338_p2), %v1734_v1  ;;  %1613 = vmatprep.subr.bf16.mxu1 (!%p338_p2), %v1736_v5  ;;  %v1689_v8 = vld [vmem:[%s2132_s1 + $0x38] sm:$0xff] (!%p338_p2)   ;;  %v666_v9 = vld [vmem:[%s2135_s4] sm:$0xff] (!%p338_p2)  ;;  %v667_v10 = vld [vmem:[%s2135_s4 + $0x8] sm:$0xff] (!%p338_p2) }
   0x9   : > { %v1614_v11 = vpack.c.bf16 (!%p338_p2), %v667_v10, %v666_v9  ;;  %v668_v12 = vld [vmem:[%s2135_s4 + $0x10] sm:$0xff] (!%p338_p2)  ;;  %v669_v13 = vld [vmem:[%s2135_s4 + $0x18] sm:$0xff] (!%p338_p2)  ;;  %v1690_v17 = vld [vmem:[%s2132_s1] sm:$0xff] (!%p338_p2)  }
   0xa   : > { %v1617_v14 = vpack.c.bf16 (!%p338_p2), %v669_v13, %v668_v12  ;;  %v1691_v19 = vld [vmem:[%s2132_s1 + $0x8] sm:$0xff] (!%p338_p2)   ;;  %v1692_v20 = vld [vmem:[%s2132_s1 + $0x10] sm:$0xff] (!%p338_p2)   ;;  %v1693_v21 = vld [vmem:[%s2132_s1 + $0x18] sm:$0xff] (!%p338_p2)  }
   0xb   : > { %1450 = vmatpush3.bf16.msra.mxu0 (!%p338_p2), %v1687_v2  ;;  %1615 = vmatpush3.bf16.msra.mxu1 (!%p338_p2), %v1614_v11  ;;  %v1694_v25 = vld [vmem:[%s2132_s1 + $0x40] sm:$0xff] (!%p338_p2)   ;;  %v1695_v26 = vld [vmem:[%s2132_s1 + $0x48] sm:$0xff] (!%p338_p2)   ;;  %v1696_v27 = vld [vmem:[%s2132_s1 + $0x50] sm:$0xff] (!%p338_p2)  }
   0xc   : > { %1451 = vmatprep.subr.bf16.mxu0 (!%p338_p2), %v1734_v1  ;;  %1616 = vmatprep.subr.bf16.mxu1 (!%p338_p2), %v1736_v5  ;;  %v1697_v28 = vld [vmem:[%s2132_s1 + $0x58] sm:$0xff] (!%p338_p2)   ;;  %v670_v32 = vld [vmem:[%s2135_s4 + $0x20] sm:$0xff] (!%p338_p2)  ;;  %v671_v33 = vld [vmem:[%s2135_s4 + $0x28] sm:$0xff] (!%p338_p2) }
   0xd   : > { %s2144_s18 = smov (!%p377_p3, %s1262_s18), 1  ;;  %v1620_v34 = vpack.c.bf16 %v671_v33, %v670_v32  ;;  %v672_v35 = vld [vmem:[%s2135_s4 + $0x30] sm:$0xff]  ;;  %v673_v36 = vld [vmem:[%s2135_s4 + $0x38] sm:$0xff]  ;;  %v674_v38 = vld [vmem:[%s2135_s4 + $0x40] sm:$0xff] }
   0xe   : > { %s1365_s25 = sshll.u32 %s2144_s18, 3  ;;  %v1623_v37 = vpack.c.bf16 %v673_v36, %v672_v35  ;;  %v675_v39 = vld [vmem:[%s2135_s4 + $0x48] sm:$0xff]  ;;  %v676_v41 = vld [vmem:[%s2135_s4 + $0x50] sm:$0xff]  ;;  %v677_v42 = vld [vmem:[%s2135_s4 + $0x58] sm:$0xff]  ;;  %s1366_s16 = sshll.u32 %s2144_s18, 4 }
   0xf   : > { %s381_s28 = scalar_lea.vmem %s2131_s0, %s1365_s25  ;;  %1452 = vmatpush3.bf16.msra.mxu0 %v1688_v3  ;;  %1618 = vmatpush3.bf16.msra.mxu1 %v1617_v14  ;;  %v1626_v40 = vpack.c.bf16 %v675_v39, %v674_v38  ;;  %v1629_v43 = vpack.c.bf16 %v677_v42, %v676_v41  ;;  %v678_v44 = vld [vmem:[%s2135_s4 + $0x60] sm:$0xff]  ;;  %v679_v45 = vld [vmem:[%s2135_s4 + $0x68] sm:$0xff]  ;;  %v680_v46 = vld [vmem:[%s2135_s4 + $0x70] sm:$0xff]  ;;  %s386_s21 = scalar_lea.vmem %s2142_s11, %s1366_s16 }
  0x10   : > { %v1368_v4 = vld [vmem:[%s381_s28] sm:$0xff]   ;;  %1453 = vmatprep.subr.bf16.mxu0 %v1734_v1  ;;  %1619 = vmatprep.subr.bf16.mxu1 %v1736_v5  ;;  %v1632_v47 = vpack.c.bf16 %v679_v45, %v678_v44  ;;  %v681_v48 = vld [vmem:[%s2135_s4 + $0x78] sm:$0xff]  ;;  %v756_v10 = vld [vmem:[%s2137_s6 + $0x10] sm:$0xff] }
  0x11   : > { %v1369_v6 = vunpack.c.l.bf16 %v1368_v4  ;;  %v1370_v7 = vunpack.c.h.bf16 %v1368_v4  ;;  %v1635_v49 = vpack.c.bf16 %v681_v48, %v680_v46  ;;  %v1302_v50 = vld [vmem:[%s2133_s2] ss:$0 sm:$0xff]  ;;  %v757_v11 = vld [vmem:[%s2137_s6 + $0x18] sm:$0xff]  ;;  %v759_v14 = vld [vmem:[%s2137_s6 + $0x28] sm:$0xff] }
  0x12   : > { %v1303_v52 = vld [vmem:[%s2134_s3] ss:$0 sm:$0xff]  ;;  %v1641_v12 = vpack.c.bf16 %v757_v11, %v756_v10  ;;  %v1701_v36 = vld [vmem:[%s2139_s8 + $0x48] sm:$0xff]   ;;  %v1703_v38 = vld [vmem:[%s2139_s8 + $0x50] sm:$0xff]  }
  0x13   : > { %396 = vst.msk [vmem:[#allocation2 + $0x1] sm:$0xff] %vm395_vm2, %v1369_v6  ;;  %397 = vst.msk [vmem:[#allocation2 + $0x9] sm:$0xff] %vm395_vm2, %v1370_v7  ;;  %1454 = vmatpush3.bf16.msra.mxu0 %v1689_v8  ;;  %1621 = vmatpush3.bf16.msra.mxu1 %v1620_v34  ;;  %v754_v4 = vld [vmem:[%s2137_s6] sm:$0xff]  ;;  %v755_v6 = vld [vmem:[%s2137_s6 + $0x8] sm:$0xff] }
  0x14   : > { %1459 = vmatprep.subr.bf16.mxu0 %v1734_v1  ;;  %1622 = vmatprep.subr.bf16.mxu1 %v1736_v5  ;;  %v1638_v8 = vpack.c.bf16 %v755_v6, %v754_v4  ;;  %v758_v13 = vld [vmem:[%s2137_s6 + $0x20] sm:$0xff]  ;;  %v1700_v39 = vld [vmem:[%s2139_s8 + $0x8] sm:$0xff]   ;;  %v1702_v41 = vld [vmem:[%s2139_s8 + $0x10] sm:$0xff]  }
  0x15   : > { %v1699_v35 = vld [vmem:[%s2139_s8 + $0x40] sm:$0xff]   ;;  %v1709_v44 = vld [vmem:[%s2139_s8 + $0x68] sm:$0xff]   ;;  %v1711_v46 = vld [vmem:[%s2139_s8 + $0x70] sm:$0xff]  }
  0x16   : > { %v1707_v42 = vld [vmem:[%s2139_s8 + $0x60] sm:$0xff]   ;;  %v1713_v48 = vld [vmem:[%s2139_s8 + $0x78] sm:$0xff]  }
  0x17   : > { %1624 = vmatpush3.bf16.msra.mxu1 %v1623_v37  ;;  %v1698_v37 = vld [vmem:[%s2139_s8] sm:$0xff]  }
  0x18   : > { %1625 = vmatprep.subr.bf16.mxu1 %v1736_v5  ;;  %v1706_v45 = vld [vmem:[%s2139_s8 + $0x20] sm:$0xff]  }
  0x19   : > { %v1714_v10 = vld [vmem:[%s2139_s8 + $0x80] sm:$0xff]  }
  0x1a   : > { %v409_v15 = vld [vmem:[#allocation2 + $0x1] sm:$0xff]  ;;  %v410_v16 = vld [vmem:[#allocation2 + $0x9] sm:$0xff] }
  0x1b   : > { %v411_v18 = vpack.c.bf16 %v410_v16, %v409_v15  ;;  %v398_v22 = vld [vmem:[#allocation2] sm:$0xff]  ;;  %v399_v23 = vld [vmem:[#allocation2 + $0x8] sm:$0xff]  ;;  %1627 = vmatpush3.bf16.msra.mxu1 %v1626_v40  ;;  %v1644_v15 = vpack.c.bf16 %v759_v14, %v758_v13  ;;  %v760_v16 = vld [vmem:[%s2137_s6 + $0x30] sm:$0xff] }
  0x1c   : > { %v400_v24 = vpack.c.bf16 %v399_v23, %v398_v22  ;;  %v557_v29 = vld [vmem:[#allocation2 + $0x2] sm:$0xff]  ;;  %v558_v30 = vld [vmem:[#allocation2 + $0xa] sm:$0xff]  ;;  %1628 = vmatprep.subr.bf16.mxu1 %v1736_v5  ;;  %v765_v23 = vld [vmem:[%s2137_s6 + $0x58] sm:$0xff] }
  0x1d   : > { %1456 = vmatmul.mubr.msk.bf16.vlgmr.msra.gmra.mrb[0].mxu0 %vm395_vm2, %v411_v18  ;;  %v559_v31 = vpack.c.bf16 %v558_v30, %v557_v29  ;;  %v764_v22 = vld [vmem:[%s2137_s6 + $0x50] sm:$0xff]  ;;  %v769_v29 = vld [vmem:[%s2137_s6 + $0x78] sm:$0xff] }
  0x1e   : > { %1460 = vmatpush3.bf16.msra.mxu0 %v1690_v17  ;;  %1467 = vmatprep.mubr.msk.bf16.mxu0 %vm1735_vm0, %v1734_v1  ;;  %v761_v17 = vld [vmem:[%s2137_s6 + $0x38] sm:$0xff]  ;;  %v1720_v13 = vld [vmem:[%s2139_s8 + $0xb0] sm:$0xff]  }
  0x1f   : > { %1461 = vmatprep.subr.bf16.mxu0 %v1734_v1  ;;  %1630 = vmatpush3.bf16.msra.mxu1 %v1629_v43  ;;  %v1647_v18 = vpack.c.bf16 %v761_v17, %v760_v16  ;;  %v1705_v40 = vld [vmem:[%s2139_s8 + $0x58] sm:$0xff]  }
  0x20   : > { %1631 = vmatprep.subr.bf16.mxu1 %v1736_v5  ;;  %v1704_v43 = vld [vmem:[%s2139_s8 + $0x18] sm:$0xff]  }
  0x21   : > { %v1721_v14 = vld [vmem:[%s2139_s8 + $0xb8] sm:$0xff]  }
  0x22   : > { %1462 = vmatpush3.bf16.msra.mxu0 %v1691_v19  ;;  %v762_v19 = vld [vmem:[%s2137_s6 + $0x40] sm:$0xff] }
  0x23   : > { %1463 = vmatprep.subr.bf16.mxu0 %v1734_v1  ;;  %1633 = vmatpush3.bf16.msra.mxu1 %v1632_v47  ;;  %v1708_v47 = vld [vmem:[%s2139_s8 + $0x28] sm:$0xff]  }
  0x24   : > { %1634 = vmatprep.subr.bf16.mxu1 %v1736_v5 }
  0x26   : > { %1464 = vmatpush3.bf16.msra.mxu0 %v1692_v20  ;;  %v763_v20 = vld [vmem:[%s2137_s6 + $0x48] sm:$0xff] }
  0x27   : > { %1465 = vmatprep.subr.bf16.mxu0 %v1734_v1  ;;  %1636 = vmatpush3.bf16.msra.mxu1 %v1635_v49  ;;  %v1710_v49 = vld [vmem:[%s2139_s8 + $0x30] sm:$0xff]  }
  0x28   : > { %1637 = vmatprep.subr.bf16.mxu1 %v1736_v5 }
  0x2a   : > { %1466 = vmatpush3.bf16.msra.mxu0 %v1693_v21  ;;  %v1650_v21 = vpack.c.bf16 %v763_v20, %v762_v19 }
  0x2b   : > { %1471 = vmatprep.subr.bf16.mxu0 %v1734_v1 }
  0x2d   : > { %1468 = vmatmul.mubr.msk.bf16.vlgmr.msra.gmra.mrb[0].mxu0 %vm395_vm2, %v400_v24  ;;  %v1653_v24 = vpack.c.bf16 %v765_v23, %v764_v22  ;;  %v1361_v23 = vld [vmem:[%s2140_s9] ss:$0 sm:$0xff] }
  0x2e   : > { %1472 = vmatpush3.bf16.msra.mxu0 %v1694_v25  ;;  %1479 = vmatprep.mubr.msk.bf16.mxu0 %vm1735_vm0, %v1734_v1  ;;  %v766_v25 = vld [vmem:[%s2137_s6 + $0x60] sm:$0xff] }
  0x2f   : > { %1473 = vmatprep.subr.bf16.mxu0 %v1734_v1 }
  0x32   : > { %1474 = vmatpush3.bf16.msra.mxu0 %v1695_v26  ;;  %v767_v26 = vld [vmem:[%s2137_s6 + $0x68] sm:$0xff] }
  0x33   : > { %1475 = vmatprep.subr.bf16.mxu0 %v1734_v1 }
  0x36   : > { %1476 = vmatpush3.bf16.msra.mxu0 %v1696_v27  ;;  %v1656_v27 = vpack.c.bf16 %v767_v26, %v766_v25 }
  0x37   : > { %1477 = vmatprep.subr.bf16.mxu0 %v1734_v1 }
  0x3a   : > { %1478 = vmatpush3.bf16.msra.mxu0 %v1697_v28  ;;  %v768_v28 = vld [vmem:[%s2137_s6 + $0x70] sm:$0xff] }
  0x3b   : > { %1573 = vmatprep.subr.bf16.mxu0 %v1734_v1  ;;  %v1659_v30 = vpack.c.bf16 %v769_v29, %v768_v28 }
  0x3d   : > { %1480 = vmatmul.mubr.msk.bf16.vlgmr.msra.gmra.mrb[0].mxu0 %vm395_vm2, %v559_v31  ;;  %v682_v31 = vld [vmem:[%s2136_s5] sm:$0x1] }
  0x3e   : > { %1589 = vmatprep.mubr.msk.bf16.mxu0 %vm1735_vm0, %v1734_v1  ;;  %1574 = vmatpush3.bf16.msra.mxu0 %v1698_v37 }
  0x3f   : > { %1575 = vmatprep.subr.bf16.mxu0 %v1734_v1 }
  0x42   : > { %1576 = vmatpush3.bf16.msra.mxu0 %v1700_v39 }
  0x43   : > { %1577 = vmatprep.subr.bf16.mxu0 %v1734_v1 }
  0x46   : > { %1578 = vmatpush3.bf16.msra.mxu0 %v1702_v41 }
  0x47   : > { %1579 = vmatprep.subr.bf16.mxu0 %v1734_v1 }
  0x4a   : > { %1580 = vmatpush3.bf16.msra.mxu0 %v1704_v43 }
  0x4b   : > { %1581 = vmatprep.subr.bf16.mxu0 %v1734_v1 }
  0x4e   : > { %1582 = vmatpush3.bf16.msra.mxu0 %v1706_v45 }
  0x4f   : > { %1583 = vmatprep.subr.bf16.mxu0 %v1734_v1 }
  0x52   : > { %1584 = vmatpush3.bf16.msra.mxu0 %v1708_v47 }
  0x53   : > { %1585 = vmatprep.subr.bf16.mxu0 %v1734_v1 }
  0x56   : > { %1586 = vmatpush3.bf16.msra.mxu0 %v1710_v49 }
  0x57   : > { %1587 = vmatprep.subr.bf16.mxu0 %v1734_v1 }
 0x110   : > { %v630_v51 = vpop.f32.mrb[0].mxu0 }
 0x111   : > { %v646_v53 = vmul.f32 %v1302_v50, %v630_v51  ;;  %v1481_v54 = vpop.f32.mrb[1].mxu0  ;;  %v770_v51 = vld [vmem:[%s2138_s7] sm:$0x1] }
 0x112   : > { %v633_v55 = vpop.f32.mrb[2].mxu0 }
 0x113   : > { %v1942_v56 = vadd.f32 %v1303_v52, %v646_v53  ;;  %v647_v57 = vmul.f32 %v1302_v50, %v633_v55  ;;  %v1482_v58 = vpop.f32.mrb[3].mxu0  ;;  %v1712_v50 = vld [vmem:[%s2139_s8 + $0x38] sm:$0xff]  }
 0x114   : > { %1588 = vmatpush3.bf16.msra.mxu0 %v1712_v50 }
 0x115   : > { %v1944_v59 = vadd.f32 %v1303_v52, %v647_v57  ;;  %v657_v60 = vmax.f32 %v1942_v56, 0.0  ;;  %1593 = vmatprep.subr.bf16.mxu0 %v1734_v1  ;;  %v1715_v56 = vld [vmem:[%s2139_s8 + $0x88] sm:$0xff]  }
 0x117   : > { %v658_v61 = vmax.f32 %v1944_v59, 0.0  ;;  %v1716_v59 = vld [vmem:[%s2139_s8 + $0x90] sm:$0xff]  }
 0x119   : > { %v659_v62 = vadd.f32 %v658_v61, %v657_v60 }
 0x11b   : > { %v660_v63 = vrot.slane %v659_v62, 4 }
 0x11d   : > { %v661_v0 = vadd.f32 %v660_v63, %v659_v62  ;;  %v847_v62 = vlaneseq }
 0x11f   : > { %v662_v2 = vrot.slane %v661_v0, 2  ;;  %v848_v63 = vshrl.u32 %v847_v62, 7 }
 0x121   : > { %v663_v3 = vadd.f32 %v662_v2, %v661_v0  ;;  %v849_v0 = vsub.s32 0, %v848_v63 }
 0x123   : > { %v664_v7 = vrot.slane %v663_v3, 1 }
 0x125   : > { %v665_v9 = vadd.f32 %v664_v7, %v663_v3 }
 0x127   : > { %1516 = vmatmul.mubr.f32.vlgmr.msra.gmra.mrb[0].mxu1 %v665_v9 }
 0x128   : > { %1639 = vmatpush3.bf16.msra.mxu1 %v1638_v8  ;;  %1550 = vmatprep.mubr.msk.f32.mxu1 %vm1735_vm0, %v1734_v1 }
 0x129   : > { %1640 = vmatprep.subr.bf16.mxu1 %v1736_v5 }
 0x12c   : > { %1642 = vmatpush3.bf16.msra.mxu1 %v1641_v12  ;;  %v1719_v12 = vld [vmem:[%s2139_s8 + $0xa8] sm:$0xff]  }
 0x12d   : > { %1643 = vmatprep.subr.bf16.mxu1 %v1736_v5 }
 0x130   : > { %1645 = vmatpush3.bf16.msra.mxu1 %v1644_v15 }
 0x131   : > { %1646 = vmatprep.subr.bf16.mxu1 %v1736_v5 }
 0x134   : > { %1648 = vmatpush3.bf16.msra.mxu1 %v1647_v18 }
 0x135   : > { %1649 = vmatprep.subr.bf16.mxu1 %v1736_v5 }
 0x138   : > { %1651 = vmatpush3.bf16.msra.mxu1 %v1650_v21 }
 0x139   : > { %1652 = vmatprep.subr.bf16.mxu1 %v1736_v5 }
 0x13c   : > { %1654 = vmatpush3.bf16.msra.mxu1 %v1653_v24 }
 0x13d   : > { %1655 = vmatprep.subr.bf16.mxu1 %v1736_v5 }
 0x140   : > { %1657 = vmatpush3.bf16.msra.mxu1 %v1656_v27 }
 0x141   : > { %1658 = vmatprep.subr.bf16.mxu1 %v1736_v5 }
 0x144   : > { %1660 = vmatpush3.bf16.msra.mxu1 %v1659_v30 }
 0x145   : > { %1553 = vmatprep.subr.bf16.mxu1 %v1734_v1 }
 0x1fa   : > { %v749_v32 = vpop.f32.mrb[0].mxu1 }
 0x1fb   : > { %v750_v33 = vadd.f32 %v749_v32, %v682_v31  ;;  %v1517_v34 = vpop.f32.mrb[1].mxu1 }
 0x1fd   : > { %v753_v5 = vmax.f32 %v750_v33, 0.0 }
 0x1ff   : > { %1551 = vmatmul.mubr.f32.vlgmr.msra.gmra.mrb[2].mxu1 %v753_v5 }
 0x200   : > { %1569 = vmatprep.mubr.msk.bf16.mxu1 %vm1735_vm0, %v1734_v1  ;;  %1554 = vmatpush3.bf16.msra.mxu1 %v1699_v35 }
 0x201   : > { %1555 = vmatprep.subr.bf16.mxu1 %v1734_v1 }
 0x204   : > { %1556 = vmatpush3.bf16.msra.mxu1 %v1701_v36 }
 0x205   : > { %1557 = vmatprep.subr.bf16.mxu1 %v1734_v1 }
 0x208   : > { %1558 = vmatpush3.bf16.msra.mxu1 %v1703_v38 }
 0x209   : > { %1559 = vmatprep.subr.bf16.mxu1 %v1734_v1 }
 0x20c   : > { %1560 = vmatpush3.bf16.msra.mxu1 %v1705_v40 }
 0x20d   : > { %1561 = vmatprep.subr.bf16.mxu1 %v1734_v1 }
 0x210   : > { %1562 = vmatpush3.bf16.msra.mxu1 %v1707_v42 }
 0x211   : > { %1563 = vmatprep.subr.bf16.mxu1 %v1734_v1 }
 0x214   : > { %1564 = vmatpush3.bf16.msra.mxu1 %v1709_v44 }
 0x215   : > { %1565 = vmatprep.subr.bf16.mxu1 %v1734_v1 }
 0x218   : > { %1566 = vmatpush3.bf16.msra.mxu1 %v1711_v46 }
 0x219   : > { %1567 = vmatprep.subr.bf16.mxu1 %v1734_v1 }
 0x21c   : > { %1568 = vmatpush3.bf16.msra.mxu1 %v1713_v48 }
 0x2d2   : > { %v837_v52 = vpop.f32.mrb[2].mxu1 }
 0x2d3   : > { %v838_v53 = vadd.f32 %v837_v52, %v770_v51  ;;  %v1552_v54 = vpop.f32.mrb[3].mxu1 }
 0x2d5   : > { %v1304_v55 = vmul.f32 -1.442695, %v838_v53 }
 0x2d7   : > { %1722 = vpow2.f32 %v1304_v55 }
 0x2e1   : > { %v1723_v57 = vpop.eup %1722 }
 0x2e2   : > { %v844_v58 = vadd.f32 1.0, %v1723_v57 }
 0x2e4   : > { %1724 = vrcp.f32 %v844_v58 }
 0x2ee   : > { %v1725_v2 = vpop.eup %1724 }
 0x2ef   : > { %v850_v3 = vrot.slane %v1725_v2, %v849_v0 }
 0x2f1   : > { %v851_v4 = vmul.f32 %v850_v3, %v657_v60  ;;  %v852_v6 = vmul.f32 %v850_v3, %v658_v61  ;;  %v1717_v60 = vld [vmem:[%s2139_s8 + $0x98] sm:$0xff]   ;;  %v1718_v61 = vld [vmem:[%s2139_s8 + $0xa0] sm:$0xff]  }
 0x2f3   : > { %855 = vst [vmem:[#allocation3 + $0x1] sm:$0xff] %v851_v4  ;;  %856 = vst [vmem:[#allocation3 + $0x9] sm:$0xff] %v852_v6  ;;  %v878_v7 = vpack.c.bf16 %v852_v6, %v851_v4 }
 0x2f5   : > { %1570 = vmatmul.mubr.bf16.vlgmr.msra.gmra.mrb[4].mxu1 %v878_v7 }
 0x2fa   : > { %v857_v8 = vld [vmem:[#allocation3] sm:$0xff]  ;;  %v858_v9 = vld [vmem:[#allocation3 + $0x8] sm:$0xff] }
 0x2fb   : > { %v859_v11 = vpack.c.bf16 %v858_v9, %v857_v8  ;;  %v1074_v15 = vld [vmem:[#allocation3 + $0x2] sm:$0xff]  ;;  %v1075_v16 = vld [vmem:[#allocation3 + $0xa] sm:$0xff] }
 0x2fc   : > { %v1076_v17 = vpack.c.bf16 %v1075_v16, %v1074_v15 }
 0x2fd   : > { %1590 = vmatmul.mubr.bf16.vlgmr.msra.gmra.mrb[4].mxu0 %v859_v11 }
 0x2fe   : > { %1594 = vmatpush3.bf16.msra.mxu0 %v1714_v10  ;;  %1609 = vmatprep.mubr.msk.bf16.mxu0 %vm1735_vm0, %v1734_v1 }
 0x2ff   : > { %1595 = vmatprep.subr.bf16.mxu0 %v1734_v1 }
 0x302   : > { %1596 = vmatpush3.bf16.msra.mxu0 %v1715_v56 }
 0x303   : > { %1597 = vmatprep.subr.bf16.mxu0 %v1734_v1 }
 0x306   : > { %1598 = vmatpush3.bf16.msra.mxu0 %v1716_v59 }
 0x307   : > { %1599 = vmatprep.subr.bf16.mxu0 %v1734_v1 }
 0x30a   : > { %1600 = vmatpush3.bf16.msra.mxu0 %v1717_v60 }
 0x30b   : > { %1601 = vmatprep.subr.bf16.mxu0 %v1734_v1 }
 0x30e   : > { %1602 = vmatpush3.bf16.msra.mxu0 %v1718_v61 }
 0x30f   : > { %1603 = vmatprep.subr.bf16.mxu0 %v1734_v1 }
 0x312   : > { %1604 = vmatpush3.bf16.msra.mxu0 %v1719_v12 }
 0x313   : > { %1605 = vmatprep.subr.bf16.mxu0 %v1734_v1 }
 0x316   : > { %1606 = vmatpush3.bf16.msra.mxu0 %v1720_v13 }
 0x317   : > { %1607 = vmatprep.subr.bf16.mxu0 %v1734_v1  ;;  %v1362_v1 = vld [vmem:[%s2141_s10] ss:$0 sm:$0xff] }
 0x31a   : > { %1608 = vmatpush3.bf16.msra.mxu0 %v1721_v14 }
 0x31d   : > { %1610 = vmatmul.mubr.bf16.vlgmr.msra.gmra.mrb[4].mxu0 %v1076_v17 }
 0x3c8   : > { %v978_v18 = vpop.f32.mrb[4].mxu1 }
 0x3c9   : > { %v1571_v19 = vpop.f32.mrb[5].mxu1 }
 0x3ca   : > { %v981_v20 = vpop.f32.mrb[6].mxu1 }
 0x3cb   : > { %v1572_v21 = vpop.f32.mrb[7].mxu1 }
 0x3f0   : > { %v1176_v22 = vpop.f32.mrb[4].mxu0 }
 0x3f1   : > { %v1661_v24 = vadd.f32 %v1176_v22, %v978_v18  ;;  %v1611_v25 = vpop.f32.mrb[5].mxu0 }
 0x3f2   : > { %v1179_v26 = vpop.f32.mrb[6].mxu0 }
 0x3f3   : > { %v1192_v27 = vmul.f32 %v1661_v24, %v1361_v23  ;;  %v1662_v28 = vadd.f32 %v1179_v26, %v981_v20  ;;  %v1612_v29 = vpop.f32.mrb[7].mxu0 }
 0x3f5   : > { %v1201_v30 = vadd.f32 %v1362_v1, %v1192_v27  ;;  %v1193_v31 = vmul.f32 %v1662_v28, %v1361_v23 }
 0x3f7   : > { %v1203_v32 = vmax.f32 %v1201_v30, 0.0  ;;  %v1202_v33 = vadd.f32 %v1362_v1, %v1193_v31 }
 0x3f9   : > { %1205 = vst [vmem:[%s386_s21] sm:$0xff] %v1203_v32  ;;  %v1204_v34 = vmax.f32 %v1202_v33, 0.0 }
 0x3fb   : > { %1206 = vst [vmem:[%s386_s21 + $0x8] sm:$0xff] %v1204_v34 }
 0x3fc PF: > { %s21_s17 = sadd.s32 1, %s1732_s17  }
 0x3fd   : > { %p18_p4 = scmp.ge.s32.totalorder %s21_s17, 4  }
 0x3ff   :  { %20 = sbr.rel (!%p18_p4) target bundleno = 1 (0x1), region = 98 }

</bundles_post_ra>
